<compile_context>
chip_gen: v6e
topology: v6e:2x2x1
jax: 0.10.0
libtpu: 0.0.40
codegen_flags: <defaults>
</compile_context>

<pallas_src>
import jax
import jax.numpy as jnp
import numpy as np
from jax.experimental import pallas as pl
from jax.experimental.pallas import tpu as pltpu

EPS = 1e-5  # nn.BatchNorm2d default eps


# ---------------------------------------------------------------------------
# Kernels
# ---------------------------------------------------------------------------
def _bn_relu_conv(x_ref, scale_ref, bias_ref, bw_ref):
    """Affine-BN -> ReLU -> 3x3 SAME conv for one image in (H, W*C) layout."""
    H, WC = x_ref.shape

    # BatchNorm (global batch stats folded into per-channel scale/bias, tiled to
    # (1, W*C) in the wrapper) + ReLU.  f32, fully lane-dense.
    h = jnp.maximum(x_ref[...] * scale_ref[...] + bias_ref[...], 0.0)

    # Height shifts with zero halo, done in-register: no padded VMEM scratch,
    # no full-tensor shifted-window copies.
    zrow = jnp.zeros((1, WC), jnp.float32)
    h_up = jnp.concatenate([zrow, h[:-1, :]], axis=0)   # row r holds h[r-1]
    h_dn = jnp.concatenate([h[1:, :], zrow], axis=0)    # row r holds h[r+1]

    # 3x3 conv as 3 banded matmuls: the 3 width taps and the SAME zero padding in W
    # are folded into each (W*C, W*C) block-banded weight, so MXU contraction depth
    # is K = W*C = 128.  bf16 operands, f32 accumulation; acc initialized by the
    # first dot (no zeros + add).
    acc = jnp.dot(h_up.astype(jnp.bfloat16), bw_ref[0],
                  preferred_element_type=jnp.float32)
    acc = acc + jnp.dot(h.astype(jnp.bfloat16), bw_ref[1],
                        preferred_element_type=jnp.float32)
    acc = acc + jnp.dot(h_dn.astype(jnp.bfloat16), bw_ref[2],
                        preferred_element_type=jnp.float32)
    return acc


def bn_relu_conv_kernel(x_ref, scale_ref, bias_ref, bw_ref, out_ref):
    out_ref[...] = _bn_relu_conv(x_ref, scale_ref, bias_ref, bw_ref)


def bn_relu_conv_residual_kernel(x_ref, scale_ref, bias_ref, bw_ref, res_ref, out_ref):
    out_ref[...] = _bn_relu_conv(x_ref, scale_ref, bias_ref, bw_ref) + res_ref[...]


# ---------------------------------------------------------------------------
# Wrapper-side preprocessing
# ---------------------------------------------------------------------------
def _band_weight(w_hwio, W):
    """Fold the 3 width taps + SAME W-padding of a (3,3,Ci,Co) HWIO weight into a
    (3, W*Ci, W*Co) block-banded matrix:
       bw[kh, w_in*Ci + ci, w_out*Co + co] = w[kh, w_in - w_out + 1, ci, co]
    for |w_in - w_out| <= 1, zero elsewhere (which implements the zero padding)."""
    _, _, Ci, Co = w_hwio.shape
    P = np.zeros((3, W, W), np.float32)          # P[kw, w_in, w_out]
    for kw in range(3):
        for w_out in range(W):
            w_in = w_out + kw - 1
            if 0 <= w_in < W:
                P[kw, w_in, w_out] = 1.0
    bw = jnp.einsum('kab,hkio->haibo', jnp.asarray(P), w_hwio.astype(jnp.float32))
    return bw.reshape(3, W * Ci, W * Co)


def _bn_scale_bias(t_nhwc, gamma, beta, W):
    """Training-mode BatchNorm batch stats (global over N,H,W, biased variance)
    folded into per-channel scale/bias, tiled along W so they broadcast directly
    over the lane-dense (H, W*C) layout."""
    mean = jnp.mean(t_nhwc, axis=(0, 1, 2))
    var = jnp.mean(jnp.square(t_nhwc - mean), axis=(0, 1, 2))
    scale = gamma * jax.lax.rsqrt(var + EPS)
    bias = beta - mean * scale
    WC = W * t_nhwc.shape[-1]
    return (jnp.tile(scale, W).reshape(1, WC).astype(jnp.float32),
            jnp.tile(bias, W).reshape(1, WC).astype(jnp.float32))


def _conv_stage(x_rows, scale, bias, bw, residual=None):
    """One bn -> relu -> conv3x3 (-> +residual) stage, gridded over the batch."""
    N, H, WC = x_rows.shape
    img_spec = pl.BlockSpec((None, H, WC), lambda n: (n, 0, 0))
    vec_spec = pl.BlockSpec((1, WC), lambda n: (0, 0))
    w_spec = pl.BlockSpec((3, WC, WC), lambda n: (0, 0, 0))

    if residual is None:
        kernel = bn_relu_conv_kernel
        in_specs = [img_spec, vec_spec, vec_spec, w_spec]
        args = (x_rows, scale, bias, bw)
    else:
        kernel = bn_relu_conv_residual_kernel
        in_specs = [img_spec, vec_spec, vec_spec, w_spec, img_spec]
        args = (x_rows, scale, bias, bw, residual)

    return pl.pallas_call(
        kernel,
        out_shape=jax.ShapeDtypeStruct((N, H, WC), jnp.float32),
        grid=(N,),
        in_specs=in_specs,
        out_specs=img_spec,
        compiler_params=pltpu.CompilerParams(
            dimension_semantics=("parallel",),        # megacore sharding on v7x
            vmem_limit_bytes=32 * 1024 * 1024),       # explicit, safe on all gens
    )(*args)


def fast_wrn_block(x_nchw, w1_hwio, w2_hwio, g1, b1, g2, b2):
    """Forward pass of FastWRNBlock.  NCHW in/out (PyTorch convention)."""
    x = jnp.transpose(x_nchw, (0, 2, 3, 1)).astype(jnp.float32)   # NCHW -> NHWC
    N, H, W, C = x.shape
    x_rows = x.reshape(N, H, W * C)                               # lane-dense rows

    bw1 = _band_weight(w1_hwio, W).astype(jnp.bfloat16)
    bw2 = _band_weight(w2_hwio, W).astype(jnp.bfloat16)

    # Stage 1: bn1 -> relu -> conv1  (BN1 stats are a global batch reduction).
    scale1, bias1 = _bn_scale_bias(x, g1, b1, W)
    y1_rows = _conv_stage(x_rows, scale1, bias1, bw1)

    # Stage 2: bn2 -> relu -> conv2 -> + residual.  Split into a second pallas_call
    # so BN2's training-mode batch stats are taken over the *whole* conv1 output.
    y1 = y1_rows.reshape(N, H, W, C)
    scale2, bias2 = _bn_scale_bias(y1, g2, b2, W)
    out_rows = _conv_stage(y1_rows, scale2, bias2, bw2, residual=x_rows)

    out = out_rows.reshape(N, H, W, C)
    return jnp.transpose(out, (0, 3, 1, 2))                       # NHWC -> NCHW


# ---------------------------------------------------------------------------
# Pure-JAX reference (matches the PyTorch module in training mode, f32)
# ---------------------------------------------------------------------------
def reference_block(x_nchw, w1_hwio, w2_hwio, g1, b1, g2, b2):
    x = jnp.transpose(x_nchw, (0, 2, 3, 1)).astype(jnp.float32)

    def bn_relu(t, g, b):
        m = jnp.mean(t, axis=(0, 1, 2), keepdims=True)
        v = jnp.mean((t - m) ** 2, axis=(0, 1, 2), keepdims=True)
        return jnp.maximum((t - m) / jnp.sqrt(v + EPS) * g + b, 0.0)

    def conv(t, w):
        return jax.lax.conv_general_dilated(
            t, w, window_strides=(1, 1), padding="SAME",
            dimension_numbers=("NHWC", "HWIO", "NHWC"))

    h1 = bn_relu(x, g1, b1)
    y1 = conv(h1, w1_hwio)
    h2 = bn_relu(y1, g2, b2)
    y2 = conv(h2, w2_hwio)
    return jnp.transpose(y2 + x, (0, 3, 1, 2))


if __name__ == "__main__":
    # inplanes = outplanes = 8 (residual add requires equal channels when
    # downsample is None), stride = 1.  W * C = 16 * 8 = 128 -> lane-dense rows.
    N, C, H, W = 2, 8, 16, 16

    key = jax.random.PRNGKey(0)
    kx, kw1, kw2, kg1, kb1, kg2, kb2 = jax.random.split(key, 7)

    x = jax.random.normal(kx, (N, C, H, W), dtype=jnp.float32)

    w_std = float(np.sqrt(2.0 / (9 * C)))  # kaiming-style fan-in init
    w1 = jax.random.normal(kw1, (3, 3, C, C), dtype=jnp.float32) * w_std
    w2 = jax.random.normal(kw2, (3, 3, C, C), dtype=jnp.float32) * w_std

    g1 = 1.0 + 0.1 * jax.random.normal(kg1, (C,), dtype=jnp.float32)
    b1 = 0.1 * jax.random.normal(kb1, (C,), dtype=jnp.float32)
    g2 = 1.0 + 0.1 * jax.random.normal(kg2, (C,), dtype=jnp.float32)
    b2 = 0.1 * jax.random.normal(kb2, (C,), dtype=jnp.float32)

    out = jax.block_until_ready(fast_wrn_block(x, w1, w2, g1, b1, g2, b2))
    ref = jax.block_until_ready(reference_block(x, w1, w2, g1, b1, g2, b2))

    assert out.shape == (N, C, H, W), out.shape
    # Tolerance accounts for bf16 MXU operands (f32 accumulate) vs the f32 reference.
    np.testing.assert_allclose(np.asarray(out), np.asarray(ref), rtol=3e-2, atol=3e-2)

    print("KERNEL_OK")
</pallas_src>

<mosaic_0001>
module attributes {stable_mosaic.version = 11 : i64} {
  func.func @bn_relu_conv_kernel(%arg0: i32, %arg1: memref<1x16x128xf32, #tpu.memory_space<vmem>>, %arg2: memref<1x128xf32, #tpu.memory_space<vmem>>, %arg3: memref<1x128xf32, #tpu.memory_space<vmem>>, %arg4: memref<3x128x128xbf16, #tpu.memory_space<vmem>>, %arg5: memref<1x16x128xf32, #tpu.memory_space<vmem>>) attributes {dimension_semantics = [#tpu.dimension_semantics<parallel>], iteration_bounds = array<i64: 2>, scalar_prefetch = 0 : i64, scratch_operands = 0 : i64, tpu.core_type = #tpu.core_type<tc>, window_params = [{transform_indices = @transform_0, window_bounds = array<i64: 1, 16, 128>}, {pipeline_mode = #tpu.pipeline_mode<synchronous>, transform_indices = @transform_1, window_bounds = array<i64: 1, 128>}, {pipeline_mode = #tpu.pipeline_mode<synchronous>, transform_indices = @transform_2, window_bounds = array<i64: 1, 128>}, {pipeline_mode = #tpu.pipeline_mode<synchronous>, transform_indices = @transform_3, window_bounds = array<i64: 3, 128, 128>}, {transform_indices = @transform_4, window_bounds = array<i64: 1, 16, 128>}]} {
    %c0 = arith.constant 0 : index
    %c0_0 = arith.constant 0 : index
    %c0_1 = arith.constant 0 : index
    %0 = vector.load %arg1[%c0, %c0_0, %c0_1] : memref<1x16x128xf32, #tpu.memory_space<vmem>>, vector<1x16x128xf32>
    %1 = vector.shape_cast %0 : vector<1x16x128xf32> to vector<16x128xf32>
    %c0_2 = arith.constant 0 : index
    %c0_3 = arith.constant 0 : index
    %2 = vector.load %arg2[%c0_2, %c0_3] : memref<1x128xf32, #tpu.memory_space<vmem>>, vector<1x128xf32>
    %3 = vector.broadcast %2 : vector<1x128xf32> to vector<16x128xf32>
    %4 = arith.mulf %1, %3 : vector<16x128xf32>
    %c0_4 = arith.constant 0 : index
    %c0_5 = arith.constant 0 : index
    %5 = vector.load %arg3[%c0_4, %c0_5] : memref<1x128xf32, #tpu.memory_space<vmem>>, vector<1x128xf32>
    %6 = vector.broadcast %5 : vector<1x128xf32> to vector<16x128xf32>
    %7 = arith.addf %4, %6 : vector<16x128xf32>
    %cst = arith.constant 0.000000e+00 : f32
    %8 = vector.broadcast %cst : f32 to vector<16x128xf32>
    %9 = arith.maximumf %7, %8 : vector<16x128xf32>
    %cst_6 = arith.constant 0.000000e+00 : f32
    %10 = vector.broadcast %cst_6 : f32 to vector<1x128xf32>
    %11 = vector.extract_strided_slice %9 {offsets = [0, 0], sizes = [15, 128], strides = [1, 1]} : vector<16x128xf32> to vector<15x128xf32>
    %12 = tpu.concatenate %10, %11 in 0 : vector<1x128xf32>, vector<15x128xf32> -> vector<16x128xf32>
    %13 = vector.extract_strided_slice %9 {offsets = [1, 0], sizes = [15, 128], strides = [1, 1]} : vector<16x128xf32> to vector<15x128xf32>
    %14 = tpu.concatenate %13, %10 in 0 : vector<15x128xf32>, vector<1x128xf32> -> vector<16x128xf32>
    %15 = arith.truncf %12 : vector<16x128xf32> to vector<16x128xbf16>
    %c0_7 = arith.constant 0 : index
    %c0_8 = arith.constant 0 : index
    %c0_9 = arith.constant 0 : index
    %16 = vector.load %arg4[%c0_7, %c0_8, %c0_9] : memref<3x128x128xbf16, #tpu.memory_space<vmem>>, vector<1x128x128xbf16>
    %17 = vector.shape_cast %16 : vector<1x128x128xbf16> to vector<128x128xbf16>
    %cst_10 = arith.constant dense<0.000000e+00> : vector<16x128xf32>
    %18 = tpu.matmul %15, %17, %cst_10 {dimension_numbers = #tpu.dot_dimension_numbers<[1], [0], [0], [1], [0, 0, 1, 1], [], []>} : vector<16x128xbf16>, vector<128x128xbf16>, vector<16x128xf32> -> vector<16x128xf32>
    %19 = arith.truncf %9 : vector<16x128xf32> to vector<16x128xbf16>
    %c1 = arith.constant 1 : index
    %c0_11 = arith.constant 0 : index
    %c0_12 = arith.constant 0 : index
    %20 = vector.load %arg4[%c1, %c0_11, %c0_12] : memref<3x128x128xbf16, #tpu.memory_space<vmem>>, vector<1x128x128xbf16>
    %21 = vector.shape_cast %20 : vector<1x128x128xbf16> to vector<128x128xbf16>
    %cst_13 = arith.constant dense<0.000000e+00> : vector<16x128xf32>
    %22 = tpu.matmul %19, %21, %cst_13 {dimension_numbers = #tpu.dot_dimension_numbers<[1], [0], [0], [1], [0, 0, 1, 1], [], []>} : vector<16x128xbf16>, vector<128x128xbf16>, vector<16x128xf32> -> vector<16x128xf32>
    %23 = arith.addf %18, %22 : vector<16x128xf32>
    %24 = arith.truncf %14 : vector<16x128xf32> to vector<16x128xbf16>
    %c2 = arith.constant 2 : index
    %c0_14 = arith.constant 0 : index
    %c0_15 = arith.constant 0 : index
    %25 = vector.load %arg4[%c2, %c0_14, %c0_15] : memref<3x128x128xbf16, #tpu.memory_space<vmem>>, vector<1x128x128xbf16>
    %26 = vector.shape_cast %25 : vector<1x128x128xbf16> to vector<128x128xbf16>
    %cst_16 = arith.constant dense<0.000000e+00> : vector<16x128xf32>
    %27 = tpu.matmul %24, %26, %cst_16 {dimension_numbers = #tpu.dot_dimension_numbers<[1], [0], [0], [1], [0, 0, 1, 1], [], []>} : vector<16x128xbf16>, vector<128x128xbf16>, vector<16x128xf32> -> vector<16x128xf32>
    %28 = arith.addf %23, %27 : vector<16x128xf32>
    %c0_17 = arith.constant 0 : index
    %c0_18 = arith.constant 0 : index
    %c0_19 = arith.constant 0 : index
    %29 = vector.load %arg5[%c0_17, %c0_18, %c0_19] : memref<1x16x128xf32, #tpu.memory_space<vmem>>, vector<1x16x128xf32>
    %30 = vector.shape_cast %29 : vector<1x16x128xf32> to vector<16x128xf32>
    %31 = vector.shape_cast %28 : vector<16x128xf32> to vector<1x16x128xf32>
    tpu.vector_store %arg5[%c0_17, %c0_18, %c0_19], %31 {strides = array<i32>} : memref<1x16x128xf32, #tpu.memory_space<vmem>>, vector<1x16x128xf32>,
    return
  }
  func.func @transform_0(%arg0: i32) -> (i32, i32, i32) {
    %c0_i32 = arith.constant 0 : i32
    %c0_i32_0 = arith.constant 0 : i32
    %c0_i32_1 = arith.constant 0 : i32
    return %arg0, %c0_i32, %c0_i32_0 : i32, i32, i32
  }
  func.func @transform_1(%arg0: i32) -> (i32, i32) {
    %c0_i32 = arith.constant 0 : i32
    %c0_i32_0 = arith.constant 0 : i32
    %c0_i32_1 = arith.constant 0 : i32
    return %c0_i32, %c0_i32_0 : i32, i32
  }
  func.func @transform_2(%arg0: i32) -> (i32, i32) {
    %c0_i32 = arith.constant 0 : i32
    %c0_i32_0 = arith.constant 0 : i32
    %c0_i32_1 = arith.constant 0 : i32
    return %c0_i32, %c0_i32_0 : i32, i32
  }
  func.func @transform_3(%arg0: i32) -> (i32, i32, i32) {
    %c0_i32 = arith.constant 0 : i32
    %c0_i32_0 = arith.constant 0 : i32
    %c0_i32_1 = arith.constant 0 : i32
    %c0_i32_2 = arith.constant 0 : i32
    return %c0_i32, %c0_i32_0, %c0_i32_1 : i32, i32, i32
  }
  func.func @transform_4(%arg0: i32) -> (i32, i32, i32) {
    %c0_i32 = arith.constant 0 : i32
    %c0_i32_0 = arith.constant 0 : i32
    %c0_i32_1 = arith.constant 0 : i32
    return %arg0, %c0_i32, %c0_i32_0 : i32, i32, i32
  }
}

</mosaic_0001>

<bundles_post_ra>
// kernel: tpu_custom_call.1
= control target key start
LH: loop header
LB: loop body
LE: loop exit
PB: predicated region body
PF: predicated region fallthrough
CT: control target
= control target key end

     0   :  { %9 = vsyncpa [#allocation3], 0  ;;  %s1303_s0 = inlined_call_operand.hbm [shape: f32[2,16,128], index: 0, kind: input, shape index: {}]   ;;  %s1304_s1 = inlined_call_operand.vmem [shape: f32[1,128], index: 1, kind: input, shape index: {}]   ;;  %s1305_s2 = inlined_call_operand.vmem [shape: f32[1,128], index: 2, kind: input, shape index: {}]   ;;  %s1306_s3 = inlined_call_operand.hbm [shape: bf16[3,128,128], index: 3, kind: input, shape index: {}]   ;;  %s1307_s4 = inlined_call_operand.hbm [shape: f32[2,16,128], index: 4, kind: output, shape index: {}]  }
   0x1   :  { %11 = vsyncpa [#allocation3 + $0x1], 0 }
   0x2   :  { %12 = vsyncpa [#allocation6], 0 }
   0x3   :  { %13 = vsyncpa [#allocation4], 0 }
   0x4   :  { %15 = vsyncpa [#allocation4 + $0x1], 0  ;;  %s1080_s15 = smov 0   ;;  %s1082_s16 = smov 0  }
   0x5   :  { %s1084_s17 = smov 0   ;;  %s1086_s18 = smov 0  }
   0x6 LB: > { %s1101_s19 = sadd.s32 4294967295, %s1041_s18   ;;  %s691_s20 = sadd.s32 4294967294, %s1041_s18   ;;  %s1041_s18 = sphi %s1086_s18, %s1329_s18   ;;  %s1037_s17 = sphi %s1084_s17, %s1328_s17   ;;  %s1033_s16 = sphi %s1082_s16, %s1327_s16   ;;  %s1029_s15 = sphi %s1080_s15, %s1326_s15  }
   0x7   : > { %p41_p0 = scmp.ne.s32.totalorder %s1033_s16, %s1029_s15  ;;  %p1308_p1 = scmp.eq.s32.totalorder %s1101_s19, 0 }
   0x8   : > { %p134_p3 = scmp.eq.s32.totalorder %s691_s20, 1  ;;  %p692_p5 = scmp.ge.s32.totalorder %s1041_s18, 1 }
   0x9   : > { %p1110_p4 = por %p1308_p1, %p41_p0  ;;  %p141_p7 = scmp.lt.s32.totalorder %s1041_s18, 3 }
   0xa   : > { %p1115_p6 = por %p134_p3, %p41_p0  ;;  %s1043_s24 = smov [#allocation5]  }
   0xb   : > { %s1312_s21 = scalar_select %p1110_p4, 1, 0 }
   0xc   : > { %s1313_s22 = scalar_select %p1115_p6, 1, 0 }
   0xd   : > { %p1120_p8 = pnand %p692_p5, %p141_p7  ;;  %s159_s25 = sshll.u32 %s1043_s24, 4  ;;  %s160_s25 = int_to_ptr.vmem [resolvable:$true] %s159_s25 }
   0xe   : > { %s1134_s27 = sadd.s32 1, %s1041_s18   ;;  %s28_s28 = sadd.s32 1, %s1037_s17 }
   0xf   : > { %s1314_s23 = scalar_select %p1120_p8, 1, 0 }
  0x10   : > { %p837_p9 = pneg %p1120_p8  ;;  %s25_s29 = ssub.s32 %s1041_s18, %s1134_s27 }
  0x11   : > { %s930_s30 = scalar_lea.vmem %s160_s25, 3072  ;;  %p938_p5 = scmp.lt.s32.totalorder %s160_s25, %s160_s25 }
  0x12   : > { %p1129_p11 = pnand %p837_p9, %p1308_p1  ;;  %p931_p13 = scmp.ne.s32.totalorder %s160_s25, %s930_s30 }
  0x13   : > { %p939_p7 = scmp.lt.s32.totalorder %s930_s30, %s930_s30 }
  0x14   : > { %p921_p12 = pneg %p1129_p11 }
  0x15   : > { %p940_p10 = por %p939_p7, %p938_p5 }
  0x16   : > { %p933_p0 = pnand %p931_p13, %p921_p12 }
  0x18   : > { %p934_p3 = pneg %p933_p0 }
  0x1a   : > { %p941_p2 = pnand %p940_p10, %p934_p3 }
  0x1c   : > { %944 = shalt.err (!%p941_p2)
}
  0x1d   : > { %s1044_s5 = smov 64   ;;  %s1045_s6 = smov 4  }
  0x1e   : > { %840 = dma.hbm_to_vmem [thread:$0]  (!%p1129_p11), %s1306_s3, 3072, %s160_s25, [#allocation6], %s1044_s5, %s1044_s5, %s1045_s6  }
  0x1f   : > { %p26_p9 = scmp.eq.s32.totalorder %s25_s29, 0  ;;  %p35_p12 = scmp.ne.s32.totalorder %s1037_s17, %s1033_s16 }
  0x20   : > { %p36_p10 = scmp.eq.s32.totalorder %s1041_s18, 0  ;;  %p850_p2 = scmp.lt.s32.totalorder %s1041_s18, 2 }
  0x21   : > { %s1151_s9 = scalar_select %p26_p9, %s1037_s17, %s28_s28  }
  0x22   : > { %p37_p13 = por %p36_p10, %p35_p12  ;;  %p1316_p0 = scmp.eq.s32.totalorder %s1101_s19, 1 }
  0x23   : > { %s173_s11 = sand.u32 1, %s1037_s17   ;;  %s740_s12 = sshll.u32 %s1041_s18, 8 }
  0x24   : > { %p1155_p3 = por %p1316_p0, %p35_p12  ;;  %s695_s13 = sshll.u32 %s173_s11, 4 }
  0x25   : > { %s1164_s24 = scalar_lea.hbm %s1303_s0, %s740_s12  ;;  %s177_s25 = scalar_lea.vmem [#allocation2], %s695_s13 }
  0x26   : > { %s1317_s10 = scalar_select %p1155_p3, 1, 0 }
  0x27   : > { %s184_s26 = sshll.u32 %s177_s25, 4  ;;  %p1166_p11 = pnand %p850_p2, %p37_p13  ;;  %s1170_s26 = int_to_ptr.vmem [resolvable:$true] %s184_s26 }
  0x28   : > { %s1172_s29 = scalar_lea.sflag [#allocation3], %s173_s11  ;;  %s945_s30 = scalar_lea.hbm %s1164_s24, 256 }
  0x29   : > { %p946_p5 = scmp.ne.s32.totalorder %s1164_s24, %s945_s30  ;;  %p947_p7 = pneg %p1166_p11 }
  0x2a   : > { %s950_s7 = scalar_lea.hbm %s1303_s0, 512  ;;  %p951_p10 = scmp.lt.s32.totalorder %s1164_s24, %s1303_s0 }
  0x2b   : > { %p948_p9 = pnand %p947_p7, %p946_p5  ;;  %p952_p2 = scmp.lt.s32.totalorder %s950_s7, %s945_s30 }
  0x2d   : > { %p949_p12 = pneg %p948_p9  ;;  %p953_p13 = por %p952_p2, %p951_p10 }
  0x2f   : > { %p954_p0 = pnand %p953_p13, %p949_p12 }
  0x31   : > { %957 = shalt.err (!%p954_p0)
}
  0x32   : > { %s958_s11 = scalar_lea.vmem %s1170_s26, 256  ;;  %s1046_s13 = smov [#allocation2]  }
  0x33   : > { %p959_p1 = scmp.ne.s32.totalorder %s1170_s26, %s958_s11  ;;  %s963_s14 = sshll.u32 %s1046_s13, 4  ;;  %s964_s14 = int_to_ptr.vmem [resolvable:$false] %s963_s14 }
  0x34   : > { %s965_s20 = scalar_lea.vmem %s964_s14, 512  ;;  %p966_p9 = scmp.lt.s32.totalorder %s1170_s26, %s964_s14 }
  0x35   : > { %p961_p6 = pnand %p959_p1, %p947_p7  ;;  %p967_p3 = scmp.lt.s32.totalorder %s965_s20, %s958_s11 }
  0x37   : > { %p962_p5 = pneg %p961_p6  ;;  %p968_p4 = por %p967_p3, %p966_p9 }
  0x39   : > { %p969_p8 = pnand %p968_p4, %p962_p5 }
  0x3b   : > { %972 = shalt.err (!%p969_p8)
}
  0x3c   : > { %s1047_s25 = smov 128   ;;  %s1048_s30 = smov 8  }
  0x3d   : > { %844 = dma.hbm_to_vmem [thread:$0]  (!%p1166_p11), %s1164_s24, 256, %s1170_s26, %s1172_s29, %s1047_s25, %s1047_s25, %s1048_s30  }
  0x3e   : > { %p1319_p1 = scmp.ne.s32.totalorder %s1314_s23, 0 }
  0x3f   : > { %s1196_s5 = sand.u32 (!%p1319_p1), 1, %s1033_s16   ;;  %p1320_p4 = scmp.ne.s32.totalorder (!%p1319_p1), %s1312_s21, 0 }
  0x40   : > { %196 = sbr.rel (%p1319_p1) target bundleno = 352 (0x160), region = 36  ;;  %s699_s6 = sshll.u32 (!%p1319_p1), %s1196_s5, 4 }
  0x41   : > { %s199_s7 = scalar_lea.sflag (!%p1319_p1), [#allocation3], %s1196_s5  ;;  %s1202_s8 = scalar_lea.vmem (!%p1319_p1), [#allocation2], %s699_s6 }
  0x45   : > { %1016 = dma.done.wait (%p1320_p4), %s199_s7, 256  }
  0x46   : > { %1018 = vsyncadd (%p1320_p4), %s199_s7, 4294967040  ;;  %p1321_p6 = scmp.eq.s32.totalorder %s1101_s19, 0 }
  0x48   : > { %1020 = dma.done.wait (%p1321_p6), [#allocation6], 3072   ;;  %p1322_p8 = pmov %p1321_p6 }
  0x49   : > { %v1049_v0 = vmov 0.0   ;;  %vm1050_vm0 = vmmov 0   ;;  %v895_v1 = vld [vmem:[#allocation5 + $0x78] sm:$0xff]   ;;  %v897_v3 = vld [vmem:[#allocation5 + $0x70] sm:$0xff]   ;;  %v899_v5 = vld [vmem:[#allocation5 + $0x68] sm:$0xff]   ;;  %vm256_vm1 = vcmask 1040384  }
  0x4a   : > { %1022 = vsyncadd (%p1322_p8), [#allocation6], 4294964224  ;;  %769 = vmatprep.subr.bf16.mxu0 %v1049_v0  ;;  %789 = vmatprep.subr.bf16.mxu1 %v1049_v0  ;;  %v896_v2 = vld [vmem:[#allocation5 + $0x38] sm:$0xff]   ;;  %v898_v4 = vld [vmem:[#allocation5 + $0x30] sm:$0xff]   ;;  %vm1051_vm3 = vmmov 1   ;;  %vm263_vm5 = vcmask 1046528  }
  0x4b   : > { %785 = vmatprep.mubr.msk.bf16.mxu0 %vm1050_vm0, %v1049_v0  ;;  %805 = vmatprep.mubr.msk.bf16.mxu1 %vm1050_vm0, %v1049_v0  ;;  %v900_v6 = vld [vmem:[#allocation5 + $0x28] sm:$0xff]   ;;  %v901_v7 = vld [vmem:[#allocation5 + $0x60] sm:$0xff]   ;;  %v903_v9 = vld [vmem:[#allocation5 + $0x58] sm:$0xff]   ;;  %s230_s28 = scalar_lea.vmem [#allocation7], %s699_s6  ;;  %s741_s12 = sshll.u32 %s1101_s19, 8 }
  0x4c   : > { %770 = vmatpush3.bf16.msra.mxu0 %v895_v1  ;;  %790 = vmatpush3.bf16.msra.mxu1 %v896_v2  ;;  %v902_v8 = vld [vmem:[#allocation5 + $0x20] sm:$0xff]   ;;  %v904_v10 = vld [vmem:[#allocation5 + $0x18] sm:$0xff]   ;;  %v905_v17 = vld [vmem:[#allocation5 + $0x50] sm:$0xff]   ;;  %s608_s29 = sshll.u32 %s230_s28, 4  ;;  %s1260_s14 = scalar_lea.hbm %s1307_s4, %s741_s12  ;;  %s1255_s29 = int_to_ptr.vmem [resolvable:$true] %s608_s29 }
  0x4d   : > { %771 = vmatprep.subr.bf16.mxu0 %v1049_v0  ;;  %791 = vmatprep.subr.bf16.mxu1 %v1049_v0  ;;  %v232_v11 = vld [vmem:[%s1202_s8] sm:$0xff]  ;;  %v233_v12 = vld [vmem:[%s1202_s8 + $0x8] sm:$0xff]  ;;  %vm720_vm2 = vmneg %vm256_vm1  ;;  %s595_s20 = scalar_lea.sflag [#allocation4], %s1196_s5  ;;  %s973_s25 = scalar_lea.vmem %s1255_s29, 256 }
  0x4e   : > { %v702_v13 = vld [vmem:[%s1304_s1] ss:$0 sm:$0xff]  ;;  %v906_v18 = vld [vmem:[#allocation5 + $0x10] sm:$0xff]   ;;  %v907_v21 = vld [vmem:[#allocation5 + $0x48] sm:$0xff]   ;;  %p974_p3 = scmp.ne.s32.totalorder %s1255_s29, %s973_s25  ;;  %p1323_p11 = scmp.ne.s32.totalorder %s1317_s10, 0 }
  0x4f   : > { %v241_v14 = vmul.f32 %v702_v13, %v232_v11  ;;  %v242_v15 = vmul.f32 %v702_v13, %v233_v12  ;;  %v703_v16 = vld [vmem:[%s1305_s2] ss:$0 sm:$0xff]  ;;  %v908_v24 = vld [vmem:[#allocation5 + $0x8] sm:$0xff]   ;;  %v911_v32 = vld [vmem:[#allocation5 + $0xb8] sm:$0xff]   ;;  %s1052_s19 = smov [#allocation7]  }
  0x50   : > { %772 = vmatpush3.bf16.msra.mxu0 %v897_v3  ;;  %792 = vmatpush3.bf16.msra.mxu1 %v898_v4  ;;  %v909_v27 = vld [vmem:[#allocation5 + $0x40] sm:$0xff]   ;;  %vm721_vm4 = vmpackc.low %vm1051_vm3, %vm720_vm2  ;;  %v912_v33 = vld [vmem:[#allocation5 + $0xb0] sm:$0xff]   ;;  %p975_p7 = pnand %p974_p3, %p1323_p11  ;;  %s977_s30 = sshll.u32 %s1052_s19, 4  ;;  %s978_s30 = int_to_ptr.vmem [resolvable:$false] %s977_s30 }
  0x51   : > { %773 = vmatprep.subr.bf16.mxu0 %v1049_v0  ;;  %793 = vmatprep.subr.bf16.mxu1 %v1049_v0  ;;  %v250_v19 = vadd.f32 %v703_v16, %v241_v14  ;;  %v251_v20 = vadd.f32 %v703_v16, %v242_v15  ;;  %v910_v28 = vld [vmem:[#allocation5] sm:$0xff]   ;;  %v913_v34 = vld [vmem:[#allocation5 + $0xa8] sm:$0xff]   ;;  %v915_v36 = vld [vmem:[#allocation5 + $0x98] sm:$0xff]   ;;  %s979_s6 = scalar_lea.vmem %s978_s30, 512  ;;  %p980_p10 = scmp.lt.s32.totalorder %s1255_s29, %s978_s30 }
  0x52   : > { %v914_v35 = vld [vmem:[#allocation5 + $0xa0] sm:$0xff]   ;;  %v916_v37 = vld [vmem:[#allocation5 + $0x90] sm:$0xff]   ;;  %v917_v40 = vld [vmem:[#allocation5 + $0x88] sm:$0xff]   ;;  %p976_p12 = pneg %p975_p7  ;;  %p981_p2 = scmp.lt.s32.totalorder %s979_s6, %s973_s25 }
  0x53   : > { %v252_v22 = vmax.f32 %v250_v19, 0.0  ;;  %v253_v23 = vmax.f32 %v251_v20, 0.0  ;;  %v918_v42 = vld [vmem:[#allocation5 + $0x80] sm:$0xff]   ;;  %vm732_vm6 = vmpackc.low %vm263_vm5, %vm1051_vm3 }
  0x54   : > { %774 = vmatpush3.bf16.msra.mxu0 %v899_v5  ;;  %794 = vmatpush3.bf16.msra.mxu1 %v900_v6  ;;  %p982_p13 = por %p981_p2, %p980_p10 }
  0x55   : > { %775 = vmatprep.subr.bf16.mxu0 %v1049_v0  ;;  %795 = vmatprep.subr.bf16.mxu1 %v1049_v0  ;;  %v257_v25 = vrot.slane %v252_v22, 7  ;;  %v258_v26 = vrot.slane %v253_v23, 7  ;;  %v287_v30 = vpack.c.bf16 %v253_v23, %v252_v22  ;;  %v264_v38 = vrot.slane %v252_v22, 1 }
  0x56   : > { %v265_v39 = vrot.slane %v253_v23, 1  ;;  %p983_p0 = pnand %p982_p13, %p976_p12 }
  0x57   : > { %v259_v29 = vsel %vm256_vm1, %v257_v25, %v258_v26 }
  0x58   : > { %776 = vmatpush3.bf16.msra.mxu0 %v901_v7  ;;  %796 = vmatpush3.bf16.msra.mxu1 %v902_v8  ;;  %v722_v31 = vpack.c.bf16 %v259_v29, %v257_v25  ;;  %v266_v41 = vsel %vm263_vm5, %v264_v38, %v265_v39 }
  0x59   : > { %777 = vmatprep.subr.bf16.mxu0 %v1049_v0  ;;  %797 = vmatprep.subr.bf16.mxu1 %v1049_v0  ;;  %v733_v43 = vpack.c.bf16 %v265_v39, %v266_v41 }
  0x5c   : > { %778 = vmatpush3.bf16.msra.mxu0 %v903_v9  ;;  %798 = vmatpush3.bf16.msra.mxu1 %v904_v10 }
  0x5d   : > { %779 = vmatprep.subr.bf16.mxu0 %v1049_v0  ;;  %799 = vmatprep.subr.bf16.mxu1 %v1049_v0 }
  0x60   : > { %780 = vmatpush3.bf16.msra.mxu0 %v905_v17  ;;  %800 = vmatpush3.bf16.msra.mxu1 %v906_v18 }
  0x61   : > { %781 = vmatprep.subr.bf16.mxu0 %v1049_v0  ;;  %801 = vmatprep.subr.bf16.mxu1 %v1049_v0 }
  0x64   : > { %782 = vmatpush3.bf16.msra.mxu0 %v907_v21  ;;  %802 = vmatpush3.bf16.msra.mxu1 %v908_v24 }
  0x65   : > { %783 = vmatprep.subr.bf16.mxu0 %v1049_v0  ;;  %803 = vmatprep.subr.bf16.mxu1 %v1049_v0 }
  0x68   : > { %784 = vmatpush3.bf16.msra.mxu0 %v909_v27  ;;  %804 = vmatpush3.bf16.msra.mxu1 %v910_v28 }
  0x69   : > { %809 = vmatprep.subr.bf16.mxu0 %v1049_v0 }
  0x6b   : > { %786 = vmatmul.mubr.bf16.vlgmr.msra.gmra.mxu0 %v287_v30  ;;  %806 = vmatmul.mubr.msk.bf16.vlgmr.msra.gmra.mxu1 %vm721_vm4, %v722_v31 }
  0x6c   : > { %810 = vmatpush3.bf16.msra.mxu0 %v911_v32  ;;  %825 = vmatprep.mubr.msk.bf16.mxu0 %vm1050_vm0, %v1049_v0 }
  0x6d   : > { %811 = vmatprep.subr.bf16.mxu0 %v1049_v0 }
  0x70   : > { %812 = vmatpush3.bf16.msra.mxu0 %v912_v33 }
  0x71   : > { %813 = vmatprep.subr.bf16.mxu0 %v1049_v0 }
  0x74   : > { %814 = vmatpush3.bf16.msra.mxu0 %v913_v34 }
  0x75   : > { %815 = vmatprep.subr.bf16.mxu0 %v1049_v0 }
  0x78   : > { %816 = vmatpush3.bf16.msra.mxu0 %v914_v35 }
  0x79   : > { %817 = vmatprep.subr.bf16.mxu0 %v1049_v0 }
  0x7c   : > { %818 = vmatpush3.bf16.msra.mxu0 %v915_v36 }
  0x7d   : > { %819 = vmatprep.subr.bf16.mxu0 %v1049_v0 }
  0x80   : > { %820 = vmatpush3.bf16.msra.mxu0 %v916_v37 }
  0x81   : > { %821 = vmatprep.subr.bf16.mxu0 %v1049_v0 }
  0x84   : > { %822 = vmatpush3.bf16.msra.mxu0 %v917_v40 }
  0x85   : > { %823 = vmatprep.subr.bf16.mxu0 %v1049_v0 }
  0x88   : > { %824 = vmatpush3.bf16.msra.mxu0 %v918_v42 }
  0x8b   : > { %826 = vmatmul.mubr.msk.bf16.vlgmr.msra.gmra.mxu0 %vm732_vm6, %v733_v43 }
 0x12b   : > { %v387_v44 = vpop.f32.mrf.mxu0  ;;  %v476_v45 = vpop.f32.mrf.mxu1 }
 0x12c   : > { %v477_v52 = vadd.f32 %v476_v45, %v387_v44 }
 0x12d   : > { %v787_v46 = vpop.f32.mrf.mxu0  ;;  %v807_v47 = vpop.f32.mrf.mxu1 }
 0x12f   : > { %v390_v48 = vpop.f32.mrf.mxu0  ;;  %v479_v49 = vpop.f32.mrf.mxu1 }
 0x130   : > { %v480_v56 = vadd.f32 %v479_v49, %v390_v48 }
 0x131   : > { %v788_v50 = vpop.f32.mrf.mxu0  ;;  %v808_v51 = vpop.f32.mrf.mxu1 }
 0x14b   : > { %v583_v53 = vpop.f32.mrf.mxu0 }
 0x14c   : > { %v590_v54 = vadd.f32 %v583_v53, %v477_v52 }
 0x14d   : > { %v827_v55 = vpop.f32.mrf.mxu0 }
 0x14e   : > { %592 = vst [vmem:[%s230_s28] sm:$0xff] %v590_v54 }
 0x14f   : > { %v586_v57 = vpop.f32.mrf.mxu0 }
 0x150   : > { %v591_v58 = vadd.f32 %v586_v57, %v480_v56 }
 0x151   : > { %v828_v59 = vpop.f32.mrf.mxu0 }
 0x152   : > { %593 = vst [vmem:[%s230_s28 + $0x8] sm:$0xff] %v591_v58 }
 0x153   : > { %986 = shalt.err (!%p983_p0)
}
 0x154   : > { %s987_s7 = scalar_lea.hbm %s1260_s14, 256  ;;  %s991_s23 = scalar_lea.hbm %s1307_s4, 512 }
 0x155   : > { %p988_p5 = scmp.ne.s32.totalorder %s1260_s14, %s987_s7  ;;  %p992_p4 = scmp.lt.s32.totalorder %s1260_s14, %s1307_s4 }
 0x156   : > { %p993_p6 = scmp.lt.s32.totalorder %s991_s23, %s987_s7 }
 0x157   : > { %p989_p9 = pnand %p988_p5, %p1323_p11 }
 0x158   : > { %p994_p8 = por %p993_p6, %p992_p4 }
 0x159   : > { %p990_p1 = pneg %p989_p9 }
 0x15b   : > { %p995_p3 = pnand %p994_p8, %p990_p1 }
 0x15d   : > { %998 = shalt.err (!%p995_p3)
}
 0x15e   : > { %s1053_s28 = smov 128   ;;  %s1054_s12 = smov 8  }
 0x15f   : > { %835 = dma.vmem_to_hbm [thread:$0]  (%p1323_p11), %s1255_s29, 256, %s1260_s14, %s595_s20, %s1053_s28, %s1053_s28, %s1054_s12  }
 0x160 PF: > { %s623_s11 = sand.u32 1, %s1029_s15   ;;  %p1324_p7 = scmp.ne.s32.totalorder %s1313_s22, 0 }
 0x161   : > { %p1325_p12 = scmp.ge.s32.totalorder %s1041_s18, 2  ;;  %s624_s13 = scalar_lea.sflag [#allocation4], %s623_s11 }
 0x163   : > { %p846_p10 = pnand %p1325_p12, %p1324_p7 }
 0x165   : > { %p847_p2 = pneg %p846_p10 }
 0x167   : > { %1024 = dma.done.wait (%p847_p2), %s624_s13, 256  }
 0x168   : > { %1026 = vsyncadd (%p847_p2), %s624_s13, 4294967040  ;;  %p18_p13 = scmp.ge.s32.totalorder %s1134_s27, 4   ;;  %s1326_s15 = smov %s1033_s16 }
 0x169   : > { %s1327_s16 = smov %s1037_s17  ;;  %s1328_s17 = smov %s1151_s9 }
 0x16a   : > { %s1329_s18 = smov %s1134_s27  ;;  %20 = sbr.rel (!%p18_p13) target bundleno = 6 (0x6), region = 87 }
 0x16f   :  { %629 = vsyncpa [#allocation3], 1 }
 0x170   :  { %631 = vsyncpa [#allocation3 + $0x1], 1 }
 0x171   :  { %632 = vsyncpa [#allocation6], 1 }
 0x172   :  { %633 = vsyncpa [#allocation4], 1 }
 0x173   :  { %635 = vsyncpa [#allocation4 + $0x1], 1 }

</bundles_post_ra>
